<compile_context>
chip_gen: v7x
topology: tpu7x:2x2x1
jax: 0.10.0
libtpu: 0.0.40
codegen_flags: <defaults>
</compile_context>

<pallas_src>
import functools

import jax
import jax.numpy as jnp
from jax.experimental import pallas as pl
from jax.experimental.pallas import tpu as pltpu


# --------------------------------------------------------------------------
# Path A: fused kernel, one batch element (C, D, S) resident in VMEM.
# --------------------------------------------------------------------------
def _pe_fused_kernel(x_ref, w1_ref, b1_ref, w2_ref, b2_ref, eh_ref, ew_ref,
                     o_ref, xs_ref, *, dt):
    # x_ref / o_ref: (C, D, S) with S = H*W (lane-dense).
    # w1: (Cr, C), b1: (Cr, 1), w2: (C, Cr), b2: (C, 1).
    # eh: (H, S), eh[h, l] = (l // W == h);  ew: (W, S), ew[w, l] = (l % W == w).
    # xs_ref: (C, S) f32 scratch (sum of x over D).
    C, D, S = x_ref.shape
    H = eh_ref.shape[0]
    W = ew_ref.shape[0]
    nd = D // dt

    w1 = w1_ref[...]
    b1 = b1_ref[...]
    w2 = w2_ref[...]
    b2 = b2_ref[...]
    eh = eh_ref[...]
    ew = ew_ref[...]

    inv_hw = 1.0 / float(H * W)
    inv_dw = 1.0 / float(D * W)
    inv_dh = 1.0 / float(D * H)

    def d_slice(i):
        if nd == 1:
            return slice(None)           # static full slice, no dynamic start
        return pl.ds(pl.multiple_of(i * dt, dt), dt)

    # ---- pass 1: squeeze over D, chunked so the f32 temp is (C, dt, S) ------
    xs_ref[...] = jnp.zeros_like(xs_ref)

    @pl.loop(0, nd)
    def _(i):
        xs_ref[...] += jnp.sum(x_ref[:, d_slice(i), :].astype(jnp.float32),
                               axis=1)

    # ---- conv_c factored through the tiny pooled projections (MXU) ----------
    xs = xs_ref[...]                                                    # (C, S)
    sq_h = jnp.einsum('cs,hs->ch', xs, eh,
                      preferred_element_type=jnp.float32) * inv_dw      # (C, H)
    sq_w = jnp.einsum('cs,ws->cw', xs, ew,
                      preferred_element_type=jnp.float32) * inv_dh      # (C, W)
    a_h = jnp.dot(w1, sq_h, preferred_element_type=jnp.float32)         # (Cr, H)
    a_w = jnp.dot(w1, sq_w, preferred_element_type=jnp.float32)         # (Cr, W)
    # a_hw[r, h*W + w] = a_h[r, h] + a_w[r, w], conv_c bias folded in.
    a_hw = (jnp.dot(a_h, eh, preferred_element_type=jnp.float32) +
            jnp.dot(a_w, ew, preferred_element_type=jnp.float32) + b1)  # (Cr, S)

    # ---- pass 2: batched gate, one lane-dense multiple-of-8 D chunk ---------
    @pl.loop(0, nd)
    def _(i):
        dsl = d_slice(i)
        xt = x_ref[:, dsl, :]                                            # (C, dt, S)
        # sq_d for this chunk only depends on this chunk -> recompute locally.
        sd = jnp.sum(xt.astype(jnp.float32), axis=2)                     # (C, dt)
        ad = jnp.dot(w1, sd, preferred_element_type=jnp.float32) * inv_hw  # (Cr, dt)
        z = jnp.maximum(ad[:, :, None] + a_hw[:, None, :], 0.0)          # (Cr, dt, S)
        g = jnp.einsum('cr,rds->cds', w2, z,
                       preferred_element_type=jnp.float32) + b2[:, None, :]
        # sigmoid on the EUP slot: exp + approximate reciprocal.
        gate = pl.reciprocal(1.0 + jnp.exp(-g), approx=True)             # (C, dt, S)
        o_ref[:, dsl, :] = (xt * gate.astype(xt.dtype)).astype(o_ref.dtype)


# --------------------------------------------------------------------------
# Path B: D-tiled gate kernel (squeeze + tiny channel mixes done in JAX).
# --------------------------------------------------------------------------
def _pe_gate_kernel(ad_ref, ahw_ref, w2_ref, b2_ref, x_ref, o_ref):
    # ad: (DT, Cr) (a_d for this D tile, D on sublanes), ahw: (Cr, S) with b1
    # folded in, w2: (C, Cr), b2: (C, 1), x/o: (C, DT, S).
    ad = ad_ref[...].astype(jnp.float32).T                               # (Cr, DT)
    a_hw = ahw_ref[...].astype(jnp.float32)                              # (Cr, S)
    w2 = w2_ref[...]
    b2 = b2_ref[...]

    z = jnp.maximum(ad[:, :, None] + a_hw[:, None, :], 0.0)              # (Cr, DT, S)
    g = jnp.einsum('cr,rds->cds', w2, z,
                   preferred_element_type=jnp.float32) + b2[:, None, :]  # (C, DT, S)
    gate = pl.reciprocal(1.0 + jnp.exp(-g), approx=True)
    xt = x_ref[...]
    o_ref[...] = (xt * gate.astype(xt.dtype)).astype(o_ref.dtype)


# --------------------------------------------------------------------------
# Wrapper helpers.
# --------------------------------------------------------------------------
def _vmem_capacity_bytes():
    try:
        info = pltpu.get_tpu_info()
        cap = getattr(info, "vmem_capacity_bytes", None)
        if cap:
            return int(cap)
    except Exception:
        pass
    return 64 * 1024 * 1024   # conservative default (v7x per-core VMEM)


def _pick_d_tile(D, per_d_bytes, budget_bytes):
    """Largest multiple-of-8 divisor of D whose footprint fits the budget
    (falls back to the smallest such divisor, or D if none exists)."""
    cands = [d for d in range(8, D + 1, 8) if D % d == 0]
    if not cands:
        return D
    best = cands[0]
    for d in cands:
        if d * per_d_bytes <= budget_bytes:
            best = d
    return best


def project_excite(x, w1, b1, w2, b2, *, force_d_tiled=False):
    """x: (B, C, D, H, W). w1: (Cr, C), b1: (Cr,), w2: (C, Cr), b2: (C,)."""
    B, C, D, H, W = x.shape
    Cr = w1.shape[0]
    S = H * W

    # Free HBM reshapes: lane-dense spatial axis, 2D biases for VMEM.
    x3 = x.reshape(B, C, D, S)
    w1c = w1.astype(jnp.float32)
    w2c = w2.astype(jnp.float32)
    b1c = b1.reshape(Cr, 1).astype(jnp.float32)
    b2c = b2.reshape(C, 1).astype(jnp.float32)

    # Constant 0/1 expansion matrices that split / rebuild the fused H*W axis.
    eh = jnp.kron(jnp.eye(H, dtype=jnp.float32), jnp.ones((1, W), jnp.float32))  # (H, S)
    ew = jnp.kron(jnp.ones((1, H), jnp.float32), jnp.eye(W, dtype=jnp.float32))  # (W, S)

    itemsize = jnp.dtype(x.dtype).itemsize
    vmem_cap = _vmem_capacity_bytes()
    big_part = vmem_cap >= 96 * 1024 * 1024               # v5e/v6e: 128 MiB; v7x: 64 MiB
    block_budget = (56 if big_part else 22) * 1024 * 1024
    vmem_limit = (96 if big_part else 48) * 1024 * 1024
    vmem_limit = int(min(vmem_limit,
                         max(vmem_cap - 8 * 1024 * 1024, 32 * 1024 * 1024)))

    # -------- Path A: fused single-block kernel (one batch element / step) ---
    slab_bytes = C * D * S * itemsize
    dt_a = _pick_d_tile(D, (3 * C + Cr) * S * 4, 4 * 1024 * 1024)
    temps_a = (3 * C + Cr) * dt_a * S * 4 + (C + 2 * Cr) * S * 4
    fused_fits = (4 * slab_bytes + temps_a) <= block_budget   # dbl-buffered in+out

    if fused_fits and not force_d_tiled:
        out3 = pl.pallas_call(
            functools.partial(_pe_fused_kernel, dt=dt_a),
            out_shape=jax.ShapeDtypeStruct((B, C, D, S), x.dtype),
            grid=(B,),
            in_specs=[
                pl.BlockSpec((None, C, D, S), lambda b: (b, 0, 0, 0)),
                pl.BlockSpec((Cr, C), lambda b: (0, 0)),
                pl.BlockSpec((Cr, 1), lambda b: (0, 0)),
                pl.BlockSpec((C, Cr), lambda b: (0, 0)),
                pl.BlockSpec((C, 1), lambda b: (0, 0)),
                pl.BlockSpec((H, S), lambda b: (0, 0)),
                pl.BlockSpec((W, S), lambda b: (0, 0)),
            ],
            out_specs=pl.BlockSpec((None, C, D, S), lambda b: (b, 0, 0, 0)),
            scratch_shapes=[pltpu.VMEM((C, S), jnp.float32)],
            compiler_params=pltpu.CompilerParams(
                dimension_semantics=("parallel",),
                vmem_limit_bytes=vmem_limit,
            ),
        )(x3, w1c, b1c, w2c, b2c, eh, ew)
        return out3.reshape(B, C, D, H, W)

    # -------- Path B: D-tiled two-pass (large volumes / small-VMEM parts) ----
    inv_hw = 1.0 / float(H * W)
    inv_dw = 1.0 / float(D * W)
    inv_dh = 1.0 / float(D * H)

    # Squeeze + tiny channel mixes in plain JAX (memory-bound reductions; the
    # pooled tensors and a_* projections are negligible in size).
    sq_d = jnp.sum(x3, axis=3, dtype=jnp.float32) * inv_hw           # (B, C, D)
    xs = jnp.sum(x3, axis=2, dtype=jnp.float32)                      # (B, C, S)
    sq_h = jnp.einsum('bcs,hs->bch', xs, eh) * inv_dw                # (B, C, H)
    sq_w = jnp.einsum('bcs,ws->bcw', xs, ew) * inv_dh                # (B, C, W)
    a_d = jnp.einsum('rc,bcd->brd', w1c, sq_d)                       # (B, Cr, D)
    a_h = jnp.einsum('rc,bch->brh', w1c, sq_h)                       # (B, Cr, H)
    a_w = jnp.einsum('rc,bcw->brw', w1c, sq_w)                       # (B, Cr, W)
    a_hw = (jnp.einsum('brh,hs->brs', a_h, eh) +
            jnp.einsum('brw,ws->brs', a_w, ew) + b1c[None, :, :])    # (B, Cr, S)
    a_d_t = jnp.transpose(a_d, (0, 2, 1))                            # (B, D, Cr)

    per_d_b = 4 * C * S * itemsize + (2 * C + Cr) * S * 4
    dt_b = _pick_d_tile(D, per_d_b, block_budget)
    nd = D // dt_b

    # TODO(synk): if profiling shows exposed DMA at small tiles, add
    # pipeline_mode=pl.Buffered(3) on the x BlockSpec (affordable on v5e/v6e).
    out3 = pl.pallas_call(
        _pe_gate_kernel,
        out_shape=jax.ShapeDtypeStruct((B, C, D, S), x.dtype),
        grid=(B, nd),
        in_specs=[
            pl.BlockSpec((None, dt_b, Cr), lambda b, d: (b, d, 0)),
            pl.BlockSpec((None, Cr, S), lambda b, d: (b, 0, 0)),
            pl.BlockSpec((C, Cr), lambda b, d: (0, 0)),
            pl.BlockSpec((C, 1), lambda b, d: (0, 0)),
            pl.BlockSpec((None, C, dt_b, S), lambda b, d: (b, 0, d, 0)),
        ],
        out_specs=pl.BlockSpec((None, C, dt_b, S), lambda b, d: (b, 0, d, 0)),
        compiler_params=pltpu.CompilerParams(
            dimension_semantics=("parallel", "parallel"),
            vmem_limit_bytes=vmem_limit,
        ),
    )(a_d_t, a_hw, w2c, b2c, x3)
    return out3.reshape(B, C, D, H, W)


def project_excite_reference(x, w1, b1, w2, b2):
    """Pure-JAX reference of the PyTorch forward."""
    sq_w = jnp.mean(x, axis=(2, 3), keepdims=True)   # (B, C, 1, 1, W)
    sq_h = jnp.mean(x, axis=(2, 4), keepdims=True)   # (B, C, 1, H, 1)
    sq_d = jnp.mean(x, axis=(3, 4), keepdims=True)   # (B, C, D, 1, 1)
    fs = sq_w + sq_h + sq_d                           # (B, C, D, H, W)
    z = jnp.einsum('rc,bcdhw->brdhw', w1, fs) + b1[None, :, None, None, None]
    z = jnp.maximum(z, 0.0)
    a = jnp.einsum('cr,brdhw->bcdhw', w2, z) + b2[None, :, None, None, None]
    return x * jax.nn.sigmoid(a)


if __name__ == "__main__":
    # Small shapes consistent with the module: batch=2, channels=4, D=8, H=16, W=16
    B, C, D, H, W = 2, 4, 8, 16, 16
    reduction_ratio = 2
    Cr = C // reduction_ratio

    key = jax.random.PRNGKey(0)
    kx, k1, k2, k3, k4 = jax.random.split(key, 5)

    x = jax.random.normal(kx, (B, C, D, H, W), dtype=jnp.float32)

    # Deterministic parameter init (1x1x1 conv weights collapse to 2D matrices).
    bound1 = 1.0 / (C ** 0.5)
    w1 = jax.random.uniform(k1, (Cr, C), jnp.float32, -bound1, bound1)   # conv_c.weight
    b1 = jax.random.uniform(k2, (Cr,), jnp.float32, -bound1, bound1)     # conv_c.bias
    bound2 = 1.0 / (Cr ** 0.5)
    w2 = jax.random.uniform(k3, (C, Cr), jnp.float32, -bound2, bound2)   # conv_cT.weight
    b2 = jax.random.uniform(k4, (C,), jnp.float32, -bound2, bound2)      # conv_cT.bias

    ref = project_excite_reference(x, w1, b1, w2, b2)

    # Fused single-block path (default at these shapes).
    out_fused = jax.block_until_ready(project_excite(x, w1, b1, w2, b2))
    assert out_fused.shape == (B, C, D, H, W)
    # Tolerance loosened slightly: gate uses EUP exp + approximate reciprocal.
    assert jnp.allclose(out_fused, ref, rtol=5e-3, atol=5e-3), "fused path mismatch"

    # D-tiled two-pass path (exercised explicitly so both paths are validated).
    out_tiled = jax.block_until_ready(
        project_excite(x, w1, b1, w2, b2, force_d_tiled=True))
    assert jnp.allclose(out_tiled, ref, rtol=5e-3, atol=5e-3), "d-tiled path mismatch"

    print("KERNEL_OK")
</pallas_src>

<mosaic_0001>
module attributes {stable_mosaic.version = 11 : i64} {
  func.func @_pe_fused_kernel(%arg0: i32, %arg1: memref<1x4x8x256xf32, #tpu.memory_space<vmem>>, %arg2: memref<2x4xf32, #tpu.memory_space<vmem>>, %arg3: memref<2x1xf32, #tpu.memory_space<vmem>>, %arg4: memref<4x2xf32, #tpu.memory_space<vmem>>, %arg5: memref<4x1xf32, #tpu.memory_space<vmem>>, %arg6: memref<16x256xf32, #tpu.memory_space<vmem>>, %arg7: memref<16x256xf32, #tpu.memory_space<vmem>>, %arg8: memref<1x4x8x256xf32, #tpu.memory_space<vmem>>, %arg9: memref<4x256xf32, #tpu.memory_space<vmem>>) attributes {dimension_semantics = [#tpu.dimension_semantics<parallel>], iteration_bounds = array<i64: 2>, scalar_prefetch = 0 : i64, scratch_operands = 1 : i64, tpu.core_type = #tpu.core_type<tc>, window_params = [{transform_indices = @transform_0, window_bounds = array<i64: 1, 4, 8, 256>}, {pipeline_mode = #tpu.pipeline_mode<synchronous>, transform_indices = @transform_1, window_bounds = array<i64: 2, 4>}, {pipeline_mode = #tpu.pipeline_mode<synchronous>, transform_indices = @transform_2, window_bounds = array<i64: 2, 1>}, {pipeline_mode = #tpu.pipeline_mode<synchronous>, transform_indices = @transform_3, window_bounds = array<i64: 4, 2>}, {pipeline_mode = #tpu.pipeline_mode<synchronous>, transform_indices = @transform_4, window_bounds = array<i64: 4, 1>}, {pipeline_mode = #tpu.pipeline_mode<synchronous>, transform_indices = @transform_5, window_bounds = array<i64: 16, 256>}, {pipeline_mode = #tpu.pipeline_mode<synchronous>, transform_indices = @transform_6, window_bounds = array<i64: 16, 256>}, {transform_indices = @transform_7, window_bounds = array<i64: 1, 4, 8, 256>}]} {
    %c0 = arith.constant 0 : index
    %c0_0 = arith.constant 0 : index
    %0 = vector.load %arg2[%c0, %c0_0] : memref<2x4xf32, #tpu.memory_space<vmem>>, vector<2x4xf32>
    %c0_1 = arith.constant 0 : index
    %c0_2 = arith.constant 0 : index
    %1 = vector.load %arg3[%c0_1, %c0_2] : memref<2x1xf32, #tpu.memory_space<vmem>>, vector<2x1xf32>
    %c0_3 = arith.constant 0 : index
    %c0_4 = arith.constant 0 : index
    %2 = vector.load %arg4[%c0_3, %c0_4] : memref<4x2xf32, #tpu.memory_space<vmem>>, vector<4x2xf32>
    %c0_5 = arith.constant 0 : index
    %c0_6 = arith.constant 0 : index
    %3 = vector.load %arg5[%c0_5, %c0_6] : memref<4x1xf32, #tpu.memory_space<vmem>>, vector<4x1xf32>
    %c0_7 = arith.constant 0 : index
    %c0_8 = arith.constant 0 : index
    %4 = vector.load %arg6[%c0_7, %c0_8] : memref<16x256xf32, #tpu.memory_space<vmem>>, vector<16x256xf32>
    %c0_9 = arith.constant 0 : index
    %c0_10 = arith.constant 0 : index
    %5 = vector.load %arg7[%c0_9, %c0_10] : memref<16x256xf32, #tpu.memory_space<vmem>>, vector<16x256xf32>
    %cst = arith.constant 0.000000e+00 : f32
    %6 = vector.broadcast %cst : f32 to vector<4x256xf32>
    %c0_11 = arith.constant 0 : index
    %c0_12 = arith.constant 0 : index
    %7 = vector.load %arg9[%c0_11, %c0_12] : memref<4x256xf32, #tpu.memory_space<vmem>>, vector<4x256xf32>
    tpu.vector_store %arg9[%c0_11, %c0_12], %6 {strides = array<i32>} : memref<4x256xf32, #tpu.memory_space<vmem>>, vector<4x256xf32>,
    %c0_i32 = arith.constant 0 : i32
    %c0_13 = arith.constant 0 : index
    %c0_14 = arith.constant 0 : index
    %8 = vector.load %arg9[%c0_13, %c0_14] : memref<4x256xf32, #tpu.memory_space<vmem>>, vector<4x256xf32>
    %c0_15 = arith.constant 0 : index
    %c0_16 = arith.constant 0 : index
    %c0_17 = arith.constant 0 : index
    %c0_18 = arith.constant 0 : index
    %9 = vector.load %arg1[%c0_15, %c0_16, %c0_17, %c0_18] : memref<1x4x8x256xf32, #tpu.memory_space<vmem>>, vector<1x4x8x256xf32>
    %10 = vector.shape_cast %9 : vector<1x4x8x256xf32> to vector<4x8x256xf32>
    %cst_19 = arith.constant dense<0.000000e+00> : vector<4x256xf32>
    %11 = vector.multi_reduction <add>, %10, %cst_19 [1] : vector<4x8x256xf32> to vector<4x256xf32>
    %12 = arith.addf %8, %11 : vector<4x256xf32>
    %c0_20 = arith.constant 0 : index
    %c0_21 = arith.constant 0 : index
    %13 = vector.load %arg9[%c0_20, %c0_21] : memref<4x256xf32, #tpu.memory_space<vmem>>, vector<4x256xf32>
    tpu.vector_store %arg9[%c0_20, %c0_21], %12 {strides = array<i32>} : memref<4x256xf32, #tpu.memory_space<vmem>>, vector<4x256xf32>,
    %c0_22 = arith.constant 0 : index
    %c0_23 = arith.constant 0 : index
    %14 = vector.load %arg9[%c0_22, %c0_23] : memref<4x256xf32, #tpu.memory_space<vmem>>, vector<4x256xf32>
    "tpu.trace_start"() <{level = 10 : i32, message = "cs,hs->ch"}> : () -> ()
    %cst_24 = arith.constant dense<0.000000e+00> : vector<4x16xf32>
    %15 = tpu.matmul %14, %4, %cst_24 {dimension_numbers = #tpu.dot_dimension_numbers<[1], [1], [0], [0], [0, 0, 1, 0], [], []>} : vector<4x256xf32>, vector<16x256xf32>, vector<4x16xf32> -> vector<4x16xf32>
    "tpu.trace_stop"() : () -> ()
    %cst_25 = arith.constant 7.812500e-03 : f32
    %16 = vector.broadcast %cst_25 : f32 to vector<4x16xf32>
    %17 = arith.mulf %15, %16 : vector<4x16xf32>
    "tpu.trace_start"() <{level = 10 : i32, message = "cs,ws->cw"}> : () -> ()
    %cst_26 = arith.constant dense<0.000000e+00> : vector<4x16xf32>
    %18 = tpu.matmul %14, %5, %cst_26 {dimension_numbers = #tpu.dot_dimension_numbers<[1], [1], [0], [0], [0, 0, 1, 0], [], []>} : vector<4x256xf32>, vector<16x256xf32>, vector<4x16xf32> -> vector<4x16xf32>
    "tpu.trace_stop"() : () -> ()
    %cst_27 = arith.constant 7.812500e-03 : f32
    %19 = vector.broadcast %cst_27 : f32 to vector<4x16xf32>
    %20 = arith.mulf %18, %19 : vector<4x16xf32>
    %cst_28 = arith.constant dense<0.000000e+00> : vector<2x16xf32>
    %21 = tpu.matmul %0, %17, %cst_28 {dimension_numbers = #tpu.dot_dimension_numbers<[1], [0], [0], [1], [0, 0, 1, 1], [], []>} : vector<2x4xf32>, vector<4x16xf32>, vector<2x16xf32> -> vector<2x16xf32>
    %cst_29 = arith.constant dense<0.000000e+00> : vector<2x16xf32>
    %22 = tpu.matmul %0, %20, %cst_29 {dimension_numbers = #tpu.dot_dimension_numbers<[1], [0], [0], [1], [0, 0, 1, 1], [], []>} : vector<2x4xf32>, vector<4x16xf32>, vector<2x16xf32> -> vector<2x16xf32>
    %cst_30 = arith.constant dense<0.000000e+00> : vector<2x256xf32>
    %23 = tpu.matmul %21, %4, %cst_30 {dimension_numbers = #tpu.dot_dimension_numbers<[1], [0], [0], [1], [0, 0, 1, 1], [], []>} : vector<2x16xf32>, vector<16x256xf32>, vector<2x256xf32> -> vector<2x256xf32>
    %cst_31 = arith.constant dense<0.000000e+00> : vector<2x256xf32>
    %24 = tpu.matmul %22, %5, %cst_31 {dimension_numbers = #tpu.dot_dimension_numbers<[1], [0], [0], [1], [0, 0, 1, 1], [], []>} : vector<2x16xf32>, vector<16x256xf32>, vector<2x256xf32> -> vector<2x256xf32>
    %25 = arith.addf %23, %24 : vector<2x256xf32>
    %26 = vector.broadcast %1 : vector<2x1xf32> to vector<2x256xf32>
    %27 = arith.addf %25, %26 : vector<2x256xf32>
    %c0_i32_32 = arith.constant 0 : i32
    %c0_33 = arith.constant 0 : index
    %c0_34 = arith.constant 0 : index
    %c0_35 = arith.constant 0 : index
    %c0_36 = arith.constant 0 : index
    %28 = vector.load %arg1[%c0_33, %c0_34, %c0_35, %c0_36] : memref<1x4x8x256xf32, #tpu.memory_space<vmem>>, vector<1x4x8x256xf32>
    %29 = vector.shape_cast %28 : vector<1x4x8x256xf32> to vector<4x8x256xf32>
    %cst_37 = arith.constant dense<0.000000e+00> : vector<4x8xf32>
    %30 = vector.multi_reduction <add>, %29, %cst_37 [2] : vector<4x8x256xf32> to vector<4x8xf32>
    %cst_38 = arith.constant dense<0.000000e+00> : vector<2x8xf32>
    %31 = tpu.matmul %0, %30, %cst_38 {dimension_numbers = #tpu.dot_dimension_numbers<[1], [0], [0], [1], [0, 0, 1, 1], [], []>} : vector<2x4xf32>, vector<4x8xf32>, vector<2x8xf32> -> vector<2x8xf32>
    %cst_39 = arith.constant 3.906250e-03 : f32
    %32 = vector.broadcast %cst_39 : f32 to vector<2x8xf32>
    %33 = arith.mulf %31, %32 : vector<2x8xf32>
    %34 = vector.shape_cast %33 : vector<2x8xf32> to vector<2x8x1xf32>
    %35 = vector.shape_cast %27 : vector<2x256xf32> to vector<2x1x256xf32>
    %36 = vector.broadcast %34 : vector<2x8x1xf32> to vector<2x8x256xf32>
    %37 = vector.broadcast %35 : vector<2x1x256xf32> to vector<2x8x256xf32>
    %38 = arith.addf %36, %37 : vector<2x8x256xf32>
    %cst_40 = arith.constant 0.000000e+00 : f32
    %39 = vector.broadcast %cst_40 : f32 to vector<2x8x256xf32>
    %40 = arith.maximumf %38, %39 : vector<2x8x256xf32>
    "tpu.trace_start"() <{level = 10 : i32, message = "cr,rds->cds"}> : () -> ()
    %cst_41 = arith.constant dense<0.000000e+00> : vector<4x8x256xf32>
    %41 = tpu.matmul %2, %40, %cst_41 {dimension_numbers = #tpu.dot_dimension_numbers<[1], [0], [0], [1, 2], [0, 0, 1, 1, 1, 2], [], []>} : vector<4x2xf32>, vector<2x8x256xf32>, vector<4x8x256xf32> -> vector<4x8x256xf32>
    "tpu.trace_stop"() : () -> ()
    %42 = vector.shape_cast %3 : vector<4x1xf32> to vector<4x1x1xf32>
    %43 = vector.broadcast %42 : vector<4x1x1xf32> to vector<4x8x256xf32>
    %44 = arith.addf %41, %43 : vector<4x8x256xf32>
    %cst_42 = arith.constant 0.000000e+00 : f32
    %45 = vector.broadcast %cst_42 : f32 to vector<4x8x256xf32>
    %46 = arith.subf %45, %44 : vector<4x8x256xf32>
    %47 = math.exp %46 : vector<4x8x256xf32>
    %cst_43 = arith.constant 1.000000e+00 : f32
    %48 = vector.broadcast %cst_43 : f32 to vector<4x8x256xf32>
    %49 = arith.addf %48, %47 : vector<4x8x256xf32>
    %50 = tpu.reciprocal %49 {approx = true} : vector<4x8x256xf32> -> vector<4x8x256xf32>
    %51 = arith.mulf %29, %50 : vector<4x8x256xf32>
    %c0_44 = arith.constant 0 : index
    %c0_45 = arith.constant 0 : index
    %c0_46 = arith.constant 0 : index
    %c0_47 = arith.constant 0 : index
    %52 = vector.load %arg8[%c0_44, %c0_45, %c0_46, %c0_47] : memref<1x4x8x256xf32, #tpu.memory_space<vmem>>, vector<1x4x8x256xf32>
    %53 = vector.shape_cast %52 : vector<1x4x8x256xf32> to vector<4x8x256xf32>
    %54 = vector.shape_cast %51 : vector<4x8x256xf32> to vector<1x4x8x256xf32>
    tpu.vector_store %arg8[%c0_44, %c0_45, %c0_46, %c0_47], %54 {strides = array<i32>} : memref<1x4x8x256xf32, #tpu.memory_space<vmem>>, vector<1x4x8x256xf32>,
    return
  }
  func.func @transform_0(%arg0: i32) -> (i32, i32, i32, i32) {
    %c0_i32 = arith.constant 0 : i32
    %c0_i32_0 = arith.constant 0 : i32
    %c0_i32_1 = arith.constant 0 : i32
    %c0_i32_2 = arith.constant 0 : i32
    return %arg0, %c0_i32, %c0_i32_0, %c0_i32_1 : i32, i32, i32, i32
  }
  func.func @transform_1(%arg0: i32) -> (i32, i32) {
    %c0_i32 = arith.constant 0 : i32
    %c0_i32_0 = arith.constant 0 : i32
    %c0_i32_1 = arith.constant 0 : i32
    return %c0_i32, %c0_i32_0 : i32, i32
  }
  func.func @transform_2(%arg0: i32) -> (i32, i32) {
    %c0_i32 = arith.constant 0 : i32
    %c0_i32_0 = arith.constant 0 : i32
    %c0_i32_1 = arith.constant 0 : i32
    return %c0_i32, %c0_i32_0 : i32, i32
  }
  func.func @transform_3(%arg0: i32) -> (i32, i32) {
    %c0_i32 = arith.constant 0 : i32
    %c0_i32_0 = arith.constant 0 : i32
    %c0_i32_1 = arith.constant 0 : i32
    return %c0_i32, %c0_i32_0 : i32, i32
  }
  func.func @transform_4(%arg0: i32) -> (i32, i32) {
    %c0_i32 = arith.constant 0 : i32
    %c0_i32_0 = arith.constant 0 : i32
    %c0_i32_1 = arith.constant 0 : i32
    return %c0_i32, %c0_i32_0 : i32, i32
  }
  func.func @transform_5(%arg0: i32) -> (i32, i32) {
    %c0_i32 = arith.constant 0 : i32
    %c0_i32_0 = arith.constant 0 : i32
    %c0_i32_1 = arith.constant 0 : i32
    return %c0_i32, %c0_i32_0 : i32, i32
  }
  func.func @transform_6(%arg0: i32) -> (i32, i32) {
    %c0_i32 = arith.constant 0 : i32
    %c0_i32_0 = arith.constant 0 : i32
    %c0_i32_1 = arith.constant 0 : i32
    return %c0_i32, %c0_i32_0 : i32, i32
  }
  func.func @transform_7(%arg0: i32) -> (i32, i32, i32, i32) {
    %c0_i32 = arith.constant 0 : i32
    %c0_i32_0 = arith.constant 0 : i32
    %c0_i32_1 = arith.constant 0 : i32
    %c0_i32_2 = arith.constant 0 : i32
    return %arg0, %c0_i32, %c0_i32_0, %c0_i32_1 : i32, i32, i32, i32
  }
}

</mosaic_0001>

<bundles_post_ra>
// kernel: tpu_custom_call.1
= control target key start
LH: loop header
LB: loop body
LE: loop exit
PB: predicated region body
PF: predicated region fallthrough
CT: control target
= control target key end

     0   :  { %s3175_s0 = inlined_call_operand.hbm [shape: f32[2,4,8,256], index: 0, kind: input, shape index: {}]   ;;  %s3176_s1 = inlined_call_operand.hbm [shape: f32[2,4], index: 1, kind: input, shape index: {}]   ;;  %s3177_s2 = inlined_call_operand.vmem [shape: f32[2,1], index: 2, kind: input, shape index: {}]   ;;  %s3178_s3 = inlined_call_operand.vmem [shape: f32[4,2], index: 3, kind: input, shape index: {}]   ;;  %s3179_s4 = inlined_call_operand.vmem [shape: f32[4,1], index: 4, kind: input, shape index: {}]   ;;  %s3180_s5 = inlined_call_operand.vmem [shape: f32[16,256], index: 5, kind: input, shape index: {}]   ;;  %s3181_s6 = inlined_call_operand.hbm [shape: f32[16,256], index: 6, kind: input, shape index: {}]   ;;  %s3182_s7 = inlined_call_operand.hbm [shape: f32[2,4,8,256], index: 7, kind: output, shape index: {}]  }
   0x1   :  { %3191 = sst [smem:[#allocation16_spill]] %s3176_s1 }
   0x2   :  { %12 = vsyncpa [#allocation4], 0 }
   0x3   :  { %14 = vsyncpa [#allocation4 + $0x1], 0 }
   0x4   :  { %15 = vsyncpa [#allocation7], 0 }
   0x5   :  { %16 = vsyncpa [#allocation5], 0 }
   0x6   :  { %18 = vsyncpa [#allocation5 + $0x1], 0  ;;  %s2733_s24 = smov 0   ;;  %s2735_s25 = smov 0  }
   0x7   :  { %s2737_s26 = smov 0   ;;  %s2739_s27 = smov 0  }
   0x8 LB: > { %3192 = sst [smem:[#allocation13_spill]] %s2673_s26  ;;  %s2754_s28 = sadd.s32 4294967295, %s2677_s27   ;;  %s2677_s27 = sphi %s2739_s27, %s3212_s27   ;;  %s2673_s26 = sphi %s2737_s26, %s3214_s26   ;;  %s2669_s25 = sphi %s2735_s25, %s3216_s25   ;;  %s2665_s24 = sphi %s2733_s24, %s3215_s24  }
   0x9   : > { %s2306_s29 = sadd.s32 4294967294, %s2677_s27   ;;  %s2758_s30 = sadd.s32 1, %s2677_s27  }
   0xa   : > { %3193 = sst [smem:[#allocation14_spill]] %s2758_s30  ;;  %s31_s8 = sadd.s32 1, %s2673_s26 }
   0xb   : > { %s28_s9 = ssub.s32 %s2677_s27, %s2758_s30  ;;  %p38_p0 = scmp.ne.s32.totalorder %s2673_s26, %s2669_s25 }
   0xc   : > { %p29_p1 = scmp.eq.s32.totalorder %s28_s9, 0  ;;  %p39_p2 = scmp.eq.s32.totalorder %s2677_s27, 0 }
   0xd   : > { %p44_p3 = scmp.ne.s32.totalorder %s2669_s25, %s2665_s24  ;;  %p3183_p4 = scmp.eq.s32.totalorder %s2754_s28, 0 }
   0xe   : > { %s2770_s10 = scalar_select %p29_p1, %s2673_s26, %s31_s8  }
   0xf   : > { %p2772_p5 = por %p39_p2, %p38_p0  ;;  %p2778_p6 = por %p3183_p4, %p44_p3 }
  0x10   : > { %3194 = sst [smem:[#allocation15_spill]] %s2770_s10  ;;  %p194_p7 = scmp.eq.s32.totalorder %s2754_s28, 1 }
  0x11   : > { %s3196_s12 = scalar_select %p2778_p6, 1, 0 }
  0x12   : > { %p200_p8 = scmp.eq.s32.totalorder %s2306_s29, 1  ;;  %p2307_p9 = scmp.ge.s32.totalorder %s2677_s27, 1 }
  0x13   : > { %p207_p10 = scmp.lt.s32.totalorder %s2677_s27, 3  ;;  %p2785_p11 = por %p194_p7, %p38_p0 }
  0x14   : > { %p2789_p12 = por %p200_p8, %p44_p3  ;;  %s2679_s16 = smov [#allocation6]  }
  0x15   : > { %s3197_s13 = scalar_select %p2785_p11, 1, 0 }
  0x16   : > { %s3198_s14 = scalar_select %p2789_p12, 1, 0 }
  0x17   : > { %p2793_p13 = pnand %p2307_p9, %p207_p10  ;;  %s220_s17 = sshll.u32 %s2679_s16, 4  ;;  %s221_s17 = int_to_ptr.vmem [resolvable:$true] %s220_s17 }
  0x18   : > { %p2439_p4 = scmp.lt.s32.totalorder %s2677_s27, 2  ;;  %p3200_p0 = scmp.eq.s32.totalorder %s2754_s28, 0 }
  0x19   : > { %s3199_s15 = scalar_select %p2793_p13, 1, 0 }
  0x1a   : > { %p2422_p2 = pneg %p2793_p13  ;;  %p2809_p3 = pnand %p2439_p4, %p2772_p5 }
  0x1b   : > { %s2680_s20 = smov [#allocation8]   ;;  %s3203_s1 = sld [smem:[#allocation16_spill]] }
  0x1c   : > { %p2803_p7 = pnand %p2422_p2, %p3200_p0  ;;  %s242_s21 = sshll.u32 %s2680_s20, 4  ;;  %s2813_s21 = int_to_ptr.vmem [resolvable:$true] %s242_s21 }
  0x1d   : > { %s3202_s19 = scalar_select %p2809_p3, 1, 0 }
  0x1e   : > { %p2523_p9 = pneg %p2803_p7 }
  0x21   : > { %s2521_s29 = scalar_lea.hbm %s3203_s1, 32 }
  0x22   : > { %p2522_p8 = scmp.ne.s32.totalorder %s3203_s1, %s2521_s29  ;;  %p2528_p10 = scmp.lt.u32.totalorder %s2521_s29, %s3203_s1 }
  0x24   : > { %p2524_p4 = pnand %p2523_p9, %p2522_p8 }
  0x26   : > { %p2525_p5 = pneg %p2524_p4 }
  0x28   : > { %p2530_p2 = pnand %p2528_p10, %p2525_p5 }
  0x2a   : > { %2533 = shalt.err (!%p2530_p2)
}
  0x2b   : > { %s2534_s20 = scalar_lea.vmem %s221_s17, 32  ;;  %p2542_p11 = scmp.lt.s32.totalorder %s221_s17, %s221_s17 }
  0x2c   : > { %p2535_p0 = scmp.ne.s32.totalorder %s221_s17, %s2534_s20  ;;  %p2543_p6 = scmp.lt.s32.totalorder %s2534_s20, %s2534_s20 }
  0x2e   : > { %p2537_p1 = pnand %p2535_p0, %p2523_p9  ;;  %p2544_p13 = por %p2543_p6, %p2542_p11 }
  0x30   : > { %p2538_p12 = pneg %p2537_p1 }
  0x32   : > { %p2545_p3 = pnand %p2544_p13, %p2538_p12 }
  0x34   : > { %2548 = shalt.err (!%p2545_p3)
}
  0x35   : > { %2425 = dma.hbm_to_vmem [thread:$0]  (!%p2803_p7), %s3203_s1, 32, %s221_s17, [#allocation7]  }
  0x36   : > { %s256_s29 = sand.u32 1, %s2673_s26   ;;  %s2549_s11 = scalar_lea.hbm %s3181_s6, 512 }
  0x37   : > { %p2550_p1 = scmp.ne.s32.totalorder %s3181_s6, %s2549_s11  ;;  %p2556_p12 = scmp.lt.u32.totalorder %s2549_s11, %s3181_s6 }
  0x39   : > { %p2552_p6 = pnand %p2550_p1, %p2523_p9 }
  0x3b   : > { %p2553_p11 = pneg %p2552_p6 }
  0x3d   : > { %p2558_p13 = pnand %p2556_p12, %p2553_p11 }
  0x3f   : > { %2561 = shalt.err (!%p2558_p13)
}
  0x40   : > { %s2562_s17 = scalar_lea.vmem %s2813_s21, 512  ;;  %p2570_p5 = scmp.lt.s32.totalorder %s2813_s21, %s2813_s21 }
  0x41   : > { %p2563_p3 = scmp.ne.s32.totalorder %s2813_s21, %s2562_s17  ;;  %p2571_p10 = scmp.lt.s32.totalorder %s2562_s17, %s2562_s17 }
  0x43   : > { %p2565_p8 = pnand %p2563_p3, %p2523_p9  ;;  %p2572_p2 = por %p2571_p10, %p2570_p5 }
  0x45   : > { %p2566_p4 = pneg %p2565_p8 }
  0x47   : > { %p2573_p0 = pnand %p2572_p2, %p2566_p4 }
  0x49   : > { %2576 = shalt.err (!%p2573_p0)
}
  0x4a   : > { %s2681_s30 = smov 256   ;;  %s2682_s10 = smov 16  }
  0x4b   : > { %2428 = dma.hbm_to_vmem [thread:$0]  (!%p2803_p7), %s3181_s6, 512, %s2813_s21, [#allocation7], %s2681_s30, %s2681_s30, %s2682_s10  }
  0x4c   : > { %s2311_s8 = sshll.u32 %s256_s29, 6  ;;  %s2369_s9 = sshll.u32 %s2677_s27, 10 }
  0x4d   : > { %s2870_s20 = scalar_lea.hbm %s3175_s0, %s2369_s9  ;;  %s260_s17 = scalar_lea.vmem [#allocation3], %s2311_s8 }
  0x4e   : > { %s267_s18 = sshll.u32 %s260_s17, 4  ;;  %s2874_s1 = scalar_lea.sflag [#allocation4], %s256_s29  ;;  %s2872_s18 = int_to_ptr.vmem [resolvable:$true] %s267_s18 }
  0x4f   : > { %s2577_s26 = scalar_lea.hbm %s2870_s20, 1024  ;;  %p3204_p7 = scmp.ne.s32.totalorder %s3202_s19, 0 }
  0x50   : > { %p2578_p9 = scmp.ne.s32.totalorder %s2870_s20, %s2577_s26  ;;  %s2582_s23 = scalar_lea.hbm %s3175_s0, 2048 }
  0x51   : > { %p2579_p1 = pneg %p3204_p7  ;;  %p2583_p12 = scmp.lt.u32.totalorder %s2870_s20, %s3175_s0 }
  0x52   : > { %p2584_p13 = scmp.lt.u32.totalorder %s2582_s23, %s2577_s26  ;;  %p2586_p8 = scmp.lt.u32.totalorder %s2577_s26, %s2870_s20 }
  0x53   : > { %p2580_p6 = pnand %p2579_p1, %p2578_p9 }
  0x54   : > { %p2585_p3 = por %p2584_p13, %p2583_p12 }
  0x55   : > { %p2581_p11 = pneg %p2580_p6 }
  0x56   : > { %p2587_p4 = por %p2586_p8, %p2585_p3 }
  0x58   : > { %p2588_p5 = pnand %p2587_p4, %p2581_p11 }
  0x5a   : > { %2591 = shalt.err (!%p2588_p5)
}
  0x5b   : > { %s2592_s29 = scalar_lea.vmem %s2872_s18, 1024  ;;  %s2683_s8 = smov [#allocation3]  }
  0x5c   : > { %p2593_p10 = scmp.ne.s32.totalorder %s2872_s18, %s2592_s29  ;;  %s2597_s16 = sshll.u32 %s2683_s8, 4  ;;  %s2598_s16 = int_to_ptr.vmem [resolvable:$false] %s2597_s16 }
  0x5d   : > { %s2599_s17 = scalar_lea.vmem %s2598_s16, 2048  ;;  %p2600_p9 = scmp.lt.s32.totalorder %s2872_s18, %s2598_s16 }
  0x5e   : > { %p2595_p2 = pnand %p2593_p10, %p2579_p1  ;;  %p2601_p6 = scmp.lt.s32.totalorder %s2599_s17, %s2592_s29 }
  0x60   : > { %p2596_p0 = pneg %p2595_p2  ;;  %p2602_p12 = por %p2601_p6, %p2600_p9 }
  0x62   : > { %p2603_p13 = pnand %p2602_p12, %p2596_p0 }
  0x64   : > { %2606 = shalt.err (!%p2603_p13)
}
  0x65   : > { %2432 = dma.hbm_to_vmem [thread:$0]  (!%p3204_p7), %s2870_s20, 1024, %s2872_s18, %s2874_s1, %s2681_s30, %s2681_s30, %s2682_s10  }
  0x66   : > { %p3205_p1 = scmp.ne.s32.totalorder %s3199_s15, 0 }
  0x67   : > { %s2908_s26 = sand.u32 (!%p3205_p1), 1, %s2669_s25   ;;  %p3206_p11 = scmp.ne.s32.totalorder (!%p3205_p1), %s3196_s12, 0 }
  0x68   : > { %279 = sbr.rel (%p3205_p1) target bundleno = 1108 (0x454), region = 48  ;;  %s2315_s21 = sshll.u32 (!%p3205_p1), %s2908_s26, 6 }
  0x69   : > { %s282_s22 = scalar_lea.sflag (!%p3205_p1), [#allocation4], %s2908_s26  ;;  %s285_s19 = scalar_lea.vmem (!%p3205_p1), [#allocation3], %s2315_s21 }
  0x6f   : > { %2652 = dma.done.wait (%p3206_p11), %s282_s22, 1024  }
  0x70   : > { %2654 = vsyncadd (%p3206_p11), %s282_s22, 4294966272  ;;  %p3207_p7 = scmp.eq.s32.totalorder %s2754_s28, 0 }
  0x72   : > { %2656 = dma.done.wait (%p3207_p7), [#allocation7], 544   ;;  %p3208_p3 = pmov %p3207_p7 }
  0x73   : > { %v333_v0 = vld [vmem:[#allocation8 + $0x8] sm:$0xff]  ;;  %v335_v1 = vld [vmem:[#allocation8 + $0x18] sm:$0xff]  ;;  %v332_v2 = vld [vmem:[#allocation8] sm:$0xff]  ;;  %vm407_vm0 = vcmask 1041409   ;;  %vm409_vm1 = vcmask 1045509   ;;  %vm412_vm2 = vcmask 1042434  }
  0x74   : > { %2658 = vsyncadd (%p3208_p3), [#allocation7], 4294966752  ;;  %v2922_v3 = vpack.c.bf16 %v335_v1, %v333_v0  ;;  %v334_v4 = vld [vmem:[#allocation8 + $0x10] sm:$0xff]  ;;  %v329_v5 = vld [vmem:[%s3180_s5 + $0x8] sm:$0xff]  ;;  %vm414_vm3 = vcmask 1046534   ;;  %vm417_vm4 = vcmask 1043459  }
  0x75   : > { %v331_v6 = vld [vmem:[%s3180_s5 + $0x18] sm:$0xff]  ;;  %v2930_v7 = vpack.c.bf16 %v334_v4, %v332_v2  ;;  %v2934_v9 = vld [vmem:[%s285_s19] sm:$0xff]  ;;  %v2936_v10 = vld [vmem:[%s285_s19 + $0x8] sm:$0xff]  ;;  %vm419_vm5 = vcmask 1047559   ;;  %vm2685_vm6 = vmmov 0   ;;  %vm574_vm7 = vcmask 1043456  }
  0x76   : > { %v2932_v8 = vpack.c.bf16 %v331_v6, %v329_v5  ;;  %v2938_v11 = vld [vmem:[%s285_s19 + $0x10] sm:$0xff]  ;;  %2397 = vmatprep.subr.bf16.mxu1 %v2922_v3  ;;  %v2941_v12 = vld [vmem:[%s285_s19 + $0x18] sm:$0xff]  ;;  %v2943_v13 = vld [vmem:[%s285_s19 + $0x20] sm:$0xff]  ;;  %v346_v15 = vrot.slane %v2934_v9, 4  ;;  %v352_v16 = vrot.slane %v2936_v10, 4  ;;  %v885_v18 = vadd.f32 %v2936_v10, %v2934_v9  ;;  %s2370_s22 = sshll.u32 %s2754_s28, 10 }
  0x77   : > { %v2945_v14 = vld [vmem:[%s285_s19 + $0x28] sm:$0xff]  ;;  %v358_v17 = vrot.slane %v2938_v11, 4  ;;  %2399 = vmatpush1.bf16.xpose.msra.mxu1 %v2930_v7  ;;  %v2954_v19 = vld [vmem:[%s285_s19 + $0x30] sm:$0xff]  ;;  %v2956_v20 = vld [vmem:[%s285_s19 + $0x38] sm:$0xff]  ;;  %v364_v21 = vrot.slane %v2941_v12, 4  ;;  %v370_v22 = vrot.slane %v2943_v13, 4  ;;  %s3127_s15 = scalar_lea.hbm %s3182_s7, %s2370_s22 }
  0x78   : > { %2393 = vmatprep.subr.bf16.mxu0 %v2932_v8  ;;  %v376_v23 = vrot.slane %v2945_v14, 4  ;;  %v891_v24 = vadd.f32 %v2945_v14, %v2943_v13  ;;  %v347_v25 = vadd.f32 %v346_v15, %v2934_v9  ;;  %v353_v26 = vadd.f32 %v352_v16, %v2936_v10  ;;  %886 = vadd.xlane.f32.xlu0 %v885_v18  ;;  %v328_v57 = vld [vmem:[%s3180_s5] sm:$0xff]  ;;  %v330_v58 = vld [vmem:[%s3180_s5 + $0x10] sm:$0xff]  ;;  %s323_s19 = scalar_lea.vmem [#allocation9], %s2315_s21  ;;  %s2201_s30 = scalar_lea.sflag [#allocation5], %s2908_s26 }
  0x79   : > { %v359_v27 = vadd.f32 %v358_v17, %v2938_v11  ;;  %v382_v28 = vrot.slane %v2954_v19, 4  ;;  %v365_v29 = vadd.f32 %v364_v21, %v2941_v12  ;;  %v371_v30 = vadd.f32 %v370_v22, %v2943_v13  ;;  %s2214_s1 = sshll.u32 %s323_s19, 4  ;;  %p3209_p4 = scmp.ne.s32.totalorder %s3197_s13, 0  ;;  %s3129_s1 = int_to_ptr.vmem [resolvable:$true] %s2214_s1 }
  0x7a   : > { %v377_v31 = vadd.f32 %v376_v23, %v2945_v14  ;;  %v388_v32 = vrot.slane %v2956_v20, 4  ;;  %892 = vadd.xlane.f32.xlu1 %v891_v24  ;;  %v348_v33 = vrot.slane %v347_v25, 2  ;;  %v354_v34 = vrot.slane %v353_v26, 2  ;;  %s2607_s10 = scalar_lea.vmem %s3129_s1, 1024  ;;  %s2690_s12 = smov [#allocation9]  }
  0x7b   : > { %v360_v35 = vrot.slane %v359_v27, 2  ;;  %v383_v36 = vadd.f32 %v382_v28, %v2954_v19  ;;  %v366_v37 = vrot.slane %v365_v29, 2  ;;  %v372_v38 = vrot.slane %v371_v30, 2  ;;  %p2608_p8 = scmp.ne.s32.totalorder %s3129_s1, %s2607_s10  ;;  %s2611_s20 = sshll.u32 %s2690_s12, 4  ;;  %s2612_s20 = int_to_ptr.vmem [resolvable:$false] %s2611_s20 }
  0x7c   : > { %v378_v39 = vrot.slane %v377_v31, 2  ;;  %v389_v40 = vadd.f32 %v388_v32, %v2956_v20  ;;  %v349_v41 = vadd.f32 %v348_v33, %v347_v25  ;;  %v355_v42 = vadd.f32 %v354_v34, %v353_v26  ;;  %s2613_s18 = scalar_lea.vmem %s2612_s20, 2048  ;;  %p2614_p2 = scmp.lt.s32.totalorder %s3129_s1, %s2612_s20 }
  0x7d   : > { %v361_v43 = vadd.f32 %v360_v35, %v359_v27  ;;  %v384_v44 = vrot.slane %v383_v36, 2  ;;  %v367_v45 = vadd.f32 %v366_v37, %v365_v29  ;;  %v373_v46 = vadd.f32 %v372_v38, %v371_v30  ;;  %p2609_p5 = pnand %p2608_p8, %p3209_p4  ;;  %p2615_p0 = scmp.lt.s32.totalorder %s2613_s18, %s2607_s10 }
  0x7e   : > { %v379_v47 = vadd.f32 %v378_v39, %v377_v31  ;;  %v390_v48 = vrot.slane %v389_v40, 2  ;;  %v350_v49 = vrot.slane %v349_v41, 1  ;;  %v356_v50 = vrot.slane %v355_v42, 1 }
  0x7f   : > { %v362_v51 = vrot.slane %v361_v43, 1  ;;  %v385_v52 = vadd.f32 %v384_v44, %v383_v36  ;;  %v368_v53 = vrot.slane %v367_v45, 1  ;;  %v374_v54 = vrot.slane %v373_v46, 1  ;;  %p2610_p10 = pneg %p2609_p5  ;;  %p2616_p9 = por %p2615_p0, %p2614_p2 }
  0x80   : > { %v380_v55 = vrot.slane %v379_v47, 1  ;;  %v391_v56 = vadd.f32 %v390_v48, %v389_v40  ;;  %v351_v59 = vadd.f32 %v350_v49, %v349_v41  ;;  %v357_v60 = vadd.f32 %v356_v50, %v355_v42  ;;  %v324_v48 = vld [vmem:[#allocation6] sm:$0x3] }
  0x81   : > { %v363_v61 = vadd.f32 %v362_v51, %v361_v43  ;;  %v386_v62 = vrot.slane %v385_v52, 1  ;;  %v369_v63 = vadd.f32 %v368_v53, %v367_v45  ;;  %v375_v0 = vadd.f32 %v374_v54, %v373_v46  ;;  %p2617_p6 = pnand %p2616_p9, %p2610_p10 }
  0x82   : > { %v381_v1 = vadd.f32 %v380_v55, %v379_v47  ;;  %v392_v2 = vrot.slane %v391_v56, 1  ;;  %v402_v5 = vcombine.low %v351_v59, %v357_v60  ;;  %v2979_v6 = vpack.c.bf16 %v330_v58, %v328_v57 }
  0x83   : > { %v387_v4 = vadd.f32 %v386_v62, %v385_v52  ;;  %v888_v15 = vadd.f32 %v2941_v12, %v2938_v11  ;;  %v403_v17 = vcombine.low %v363_v61, %v369_v63  ;;  %v894_v21 = vadd.f32 %v2956_v20, %v2954_v19 }
  0x84   : > { %v393_v16 = vadd.f32 %v392_v2, %v391_v56  ;;  %v404_v18 = vcombine.low %v375_v0, %v381_v1  ;;  %2395 = vmatpush1.bf16.xpose.msra.mxu0 %v2979_v6  ;;  %v2684_v33 = vmov 0.0   ;;  %v901_v34 = vlaneseq  ;;  %v325_v56 = vld [vmem:[%s3177_s2] sm:$0x3] }
  0x85   : > { %889 = vadd.xlane.f32.xlu0 %v888_v15  ;;  %v406_v23 = vrot.slane %v403_v17, 7  ;;  %895 = vadd.xlane.f32.xlu1 %v894_v21  ;;  %vm570_vm8 = vcmask 31744   ;;  %v2686_v57 = vmov 0   ;;  %vm721_vm9 = vcmask 130048  }
  0x86   : > { %v405_v22 = vcombine.low %v387_v4, %v393_v16  ;;  %v411_v24 = vrot.slane %v404_v18, 6  ;;  %2382 = vmatprep.subr.mxu1 %v2684_v33  ;;  %2377 = vmatprep.subr.mxu0 %v2684_v33  ;;  %v902_v36 = vand.u32 127, %v901_v34  ;;  %v2995_v37 = vshrl.u32 %v901_v34, 7 }
  0x87   : > { %v408_v25 = vsel %vm407_vm0, %v406_v23, %v402_v5  ;;  %2487 = vset.pattern.permute.xlu0 %v2686_v57  ;;  %2488 = vset.pattern.permute.xlu1 %v2686_v57  ;;  %v2687_v2 = vmov 1966171168   ;;  %v2327_v15 = vld.sshfl [vmem:[%s3179_s4] sm:$0x33 pattern:$0x75316420] }
  0x88   : > { %v416_v26 = vrot.slane %v405_v22, 5  ;;  %v410_v27 = vsel %vm409_vm1, %v406_v23, %v408_v25  ;;  %v905_v38 = vsub.s32 %v902_v36, %v2995_v37  ;;  %v1004_v63 = vsub.s32 1, %v2995_v37 }
  0x89   : > { %v413_v28 = vsel %vm412_vm2, %v411_v24, %v410_v27  ;;  %v1013_v4 = vunpack.c.l.s4 %v2687_v2  ;;  %v1070_v17 = vcombine.high %v2327_v15, %v2327_v15  ;;  %v2688_v34 = vmov 1983009808  }
  0x8a   : > { %v415_v29 = vsel %vm414_vm3, %v411_v24, %v413_v28  ;;  %vm1335_vm10 = vcmask 1041408   ;;  %vm1331_vm11 = vcmask 15360  }
  0x8b   : > { %v418_v30 = vsel %vm417_vm4, %v416_v26, %v415_v29  ;;  %v1014_v5 = vunpack.c.0.s8 %v1013_v4 }
  0x8c   : > { %v420_v31 = vsel %vm419_vm5, %v416_v26, %v418_v30 }
  0x8d   : > { %v426_v32 = vcombine.high %v420_v31, %v420_v31 }
  0x8f   : > { %563 = vmatprep.mubr.f32.mxu1 %v426_v32  ;;  %492 = vmatprep.mubr.f32.mxu0 %v426_v32 }
  0x90   : > { %564 = vmatmul.mubr.f32.vlgmr.msra.gmra.mrb[0].mxu1 %v420_v31  ;;  %493 = vmatmul.mubr.f32.vlgmr.msra.gmra.mrb[0].mxu0 %v420_v31 }
  0x91   : > { %2384 = vmatprep.mubr.msk.f32.mxu1 %vm2685_vm6, %v2684_v33  ;;  %2379 = vmatprep.mubr.msk.f32.mxu0 %vm2685_vm6, %v2684_v33 }
  0x9b   : > { %872 = vperm.xlu0 %2487, %v325_v56  }
 0x105   : > { %v887_v35 = vpop.xlane.xlu0 %886 }
 0x106   : > { %v906_v41 = vrot.slane %v887_v35, %v905_v38  ;;  %v1121_v35 = vunpack.c.l.s4 %v2688_v34 }
 0x107   : > { %v893_v39 = vpop.xlane.xlu1 %892 }
 0x108   : > { %v914_v43 = vrot.slane %v893_v39, %v905_v38 }
 0x112   : > { %v890_v40 = vpop.xlane.xlu0 %889  ;;  %v896_v44 = vpop.xlane.xlu1 %895 }
 0x113   : > { %v910_v42 = vrot.slane %v890_v40, %v905_v38  ;;  %v918_v46 = vrot.slane %v896_v44, %v905_v38 }
 0x115   : > { %v919_v45 = vsel %vm407_vm0, %v910_v42, %v906_v41  ;;  %v1122_v41 = vunpack.c.0.s8 %v1121_v35  ;;  %v2689_v42 = vmov 1934713408  }
 0x116   : > { %v920_v50 = vsel %vm412_vm2, %v914_v43, %v919_v45  ;;  %v1152_v43 = vunpack.c.l.s4 %v2689_v42 }
 0x117   : > { %v921_v55 = vsel %vm417_vm4, %v918_v46, %v920_v50 }
 0x11a   : > { %v873_v27 = vpop.permute.xlu0 %872 }
 0x163   : > { %v565_v47 = vpop.f32.mrb[0].mxu1  ;;  %v494_v49 = vpop.f32.mrb[0].mxu0 }
 0x164   : > { %v569_v51 = vmul.f32 0.0078125, %v565_v47  ;;  %v567_v52 = vpop.f32.mrb[1].mxu1  ;;  %v498_v53 = vmul.f32 0.0078125, %v494_v49  ;;  %v496_v54 = vpop.f32.mrb[1].mxu0 }
 0x165   : > { %v1153_v52 = vunpack.c.0.s8 %v1152_v43 }
 0x166   : > { %2383 = vmatpush3.msk.msra.mxu1 %vm574_vm7, %v569_v51  ;;  %2378 = vmatpush3.msk.msra.mxu0 %vm574_vm7, %v498_v53  ;;  %v3025_v51 = vsub.s32 %v1122_v41, %v2995_v37 }
 0x167   : > { %2385 = vmatmul.mubr.msk.f32.vlgmr.msra.gmra.mrb[2].mxu1 %vm570_vm8, %v324_v48  ;;  %2380 = vmatmul.mubr.msk.f32.vlgmr.msra.gmra.mrb[2].mxu0 %vm570_vm8, %v324_v48 }
 0x168   : > { %2387 = vmatprep.subr.mxu1 %v2684_v33  ;;  %2389 = vmatprep.mubr.msk.f32.mxu1 %vm2685_vm6, %v2684_v33 }
 0x169   : > { %2388 = vmatpush3.msk.msra.mxu1 %vm574_vm7, %v921_v55  ;;  %2401 = vmatprep.subr.bf16.mxu0 %v2922_v3 }
 0x16a   : > { %2403 = vmatpush1.bf16.msra.mxu0 %v2930_v7  ;;  %789 = vmatprep.mubr.f32.mxu0 %v2684_v33 }
 0x16b   : > { %2390 = vmatmul.mubr.msk.f32.vlgmr.msra.gmra.mrb[4].mxu1 %vm570_vm8, %v324_v48  ;;  %2405 = vmatprep.subr.bf16.mxu0 %v2932_v8  ;;  %v997_v8 = vsub.s32 0, %v2995_v37 }
 0x16c   : > { %1448 = vmatprep.mubr.f32.mxu1 %v2684_v33 }
 0x23a   : > { %v717_v58 = vpop.f32.mrb[2].mxu1  ;;  %v644_v3 = vpop.f32.mrb[2].mxu0 }
 0x23b   : > { %v2386_v59 = vpop.f32.mrb[3].mxu1  ;;  %2323 = vmatmul.mubr.msk.f32.vlgmr.msra.gmra.mrb[4].mxu0 %vm721_vm9, %v717_v58  ;;  %v2381_v7 = vpop.f32.mrb[3].mxu0 }
 0x23c   : > { %2407 = vmatpush1.bf16.msra.mxu0 %v2979_v6  ;;  %863 = vmatprep.mubr.f32.mxu0 %v2684_v33  ;;  %v1017_v6 = vsub.s32 %v1014_v5, %v2995_v37  ;;  %v3029_v7 = vsub.s32 %v1153_v52, %v2995_v37 }
 0x23e   : > { %v990_v60 = vpop.f32.mrb[4].mxu1  ;;  %v1077_v16 = vrot.slane %v2327_v15, %v1017_v6  ;;  %v1084_v21 = vrot.slane %v1070_v17, %v1017_v6 }
 0x23f   : > { %v994_v61 = vmul.f32 0.00390625, %v990_v60  ;;  %v2391_v62 = vpop.f32.mrb[5].mxu1 }
 0x240   : > { %v1090_v18 = vrot.slane %v1077_v16, %v997_v8  ;;  %v1094_v22 = vrot.slane %v1084_v21, %v997_v8  ;;  %v1085_v23 = vcombine.high %v1077_v16, %v1077_v16  ;;  %v1086_v25 = vcombine.high %v1084_v21, %v1084_v21 }
 0x241   : > { %v998_v0 = vrot.slane %v994_v61, %v997_v8  ;;  %v1005_v1 = vrot.slane %v994_v61, %v1004_v63 }
 0x242   : > { %v1098_v24 = vrot.slane %v1085_v23, %v997_v8  ;;  %v1102_v26 = vrot.slane %v1086_v25, %v997_v8 }
 0x243   : > { %2324 = vmatmul.mubr.msk.f32.vlgmr.msra.gmra.mrb[4].mxu0 %vm721_vm9, %v644_v3  ;;  %1000 = vbcast.lane.b32.xlu1 %v998_v0, 256 }
 0x244   : > { %1519 = vmatprep.mubr.f32.mxu0 %v2684_v33 }
 0x247   : > { %1007 = vbcast.lane.b32.xlu1 %v1005_v1, 256 }
 0x24b   : > { %1104 = vperm.xlu1 %2488, %v1090_v18  }
 0x24f   : > { %1108 = vperm.xlu1 %2488, %v1094_v22  }
 0x253   : > { %1112 = vperm.xlu1 %2488, %v1098_v24   ;;  %v326_v24 = vld [vmem:[%s3178_s3] sm:$0xf] }
 0x257   : > { %1116 = vperm.xlu1 %2488, %v1102_v26  }
 0x2b5   : > { %v1001_v38 = vpop.permute.xlu1 %1000 }
 0x2b9   : > { %v1008_v53 = vpop.permute.xlu1 %1007 }
 0x2ca   : > { %v1105_v43 = vpop.permute.xlu1 %1104 }
 0x316   : > { %v865_v28 = vpop.f32.mrb[4].mxu0 }
 0x317   : > { %v875_v29 = vadd.f32 %v873_v27, %v865_v28  ;;  %v867_v30 = vpop.f32.mrb[5].mxu0 }
 0x318   : > { %v876_v31 = vadd.f32 %v873_v27, %v867_v30 }
 0x31a   : > { %v1011_v32 = vcombine.low %v875_v29, %v876_v31 }
 0x31c   : > { %v1018_v36 = vrot.slane %v1011_v32, %v1017_v6 }
 0x31e   : > { %v1019_v39 = vcombine.high %v1018_v36, %v1018_v36  ;;  %v1026_v40 = vrot.slane %v1018_v36, %v1017_v6 }
 0x320   : > { %v1037_v44 = vrot.slane %v1026_v40, %v997_v8  ;;  %v1041_v45 = vrot.slane %v1026_v40, %v1004_v63  ;;  %v1033_v46 = vrot.slane %v1019_v39, %v1017_v6 }
 0x322   : > { %v1054_v47 = vadd.f32 %v1037_v44, %v1001_v38  ;;  %v1055_v48 = vadd.f32 %v1041_v45, %v1001_v38  ;;  %v1045_v49 = vrot.slane %v1033_v46, %v997_v8  ;;  %v1049_v50 = vrot.slane %v1033_v46, %v1004_v63  ;;  %v1109_v44 = vpop.permute.xlu1 %1108 }
 0x324   : > { %v1058_v54 = vmax.f32 %v1054_v47, 0.0  ;;  %v1059_v55 = vmax.f32 %v1055_v48, 0.0  ;;  %v1056_v56 = vadd.f32 %v1045_v49, %v1008_v53  ;;  %v1057_v57 = vadd.f32 %v1049_v50, %v1008_v53 }
 0x326   : > { %v1185_v58 = vcombine.high %v1059_v55, %v2684_v33  ;;  %v1060_v3 = vmax.f32 %v1056_v56, 0.0  ;;  %v1061_v59 = vmax.f32 %v1057_v57, 0.0  ;;  %v1126_v60 = vrot.slane %v1058_v54, %v3025_v51  ;;  %v1113_v45 = vpop.permute.xlu1 %1112 }
 0x327   : > { %v1119_v0 = vcombine.high %v1058_v54, %v2684_v33  ;;  %v1192_v1 = vrot.slane %v1059_v55, %v3025_v51  ;;  %v1251_v47 = vcombine.low %v1105_v43, %v1113_v45  ;;  %v1252_v48 = vcombine.high %v1105_v43, %v1113_v45 }
 0x328   : > { %v1134_v8 = vcombine.high %v1060_v3, %v2684_v33  ;;  %v1141_v61 = vrot.slane %v1060_v3, %v3025_v51  ;;  %v1200_v62 = vcombine.high %v1061_v59, %v2684_v33  ;;  %v1207_v63 = vrot.slane %v1061_v59, %v3025_v51 }
 0x329   : > { %v1199_v2 = vrot.slane %v1185_v58, %v3025_v51  ;;  %v1133_v18 = vrot.slane %v1119_v0, %v3025_v51  ;;  %v1259_v52 = vrot.slane %v1251_v47, %v3025_v51  ;;  %v1266_v53 = vrot.slane %v1252_v48, %v3025_v51 }
 0x32a   : > { %v1149_v4 = vcombine.low %v1126_v60, %v1141_v61  ;;  %v1214_v37 = vrot.slane %v1200_v62, %v3025_v51  ;;  %v1148_v5 = vrot.slane %v1134_v8, %v3025_v51  ;;  %v1150_v6 = vcombine.high %v1126_v60, %v1141_v61  ;;  %v1117_v46 = vpop.permute.xlu1 %1116 }
 0x32b   : > { %v1215_v15 = vcombine.low %v1192_v1, %v1207_v63  ;;  %v1216_v16 = vcombine.high %v1192_v1, %v1207_v63  ;;  %v1267_v49 = vcombine.low %v1109_v44, %v1117_v46  ;;  %v1268_v50 = vcombine.high %v1109_v44, %v1117_v46 }
 0x32c   : > { %v1157_v17 = vrot.slane %v1149_v4, %v3029_v7  ;;  %v1231_v21 = vcombine.low %v1199_v2, %v1214_v37  ;;  %v1164_v26 = vrot.slane %v1150_v6, %v3029_v7  ;;  %v1165_v27 = vcombine.low %v1133_v18, %v1148_v5 }
 0x32d   : > { %v1223_v22 = vrot.slane %v1215_v15, %v3029_v7  ;;  %v1230_v25 = vrot.slane %v1216_v16, %v3029_v7  ;;  %v1232_v29 = vcombine.high %v1199_v2, %v1214_v37  ;;  %v1166_v32 = vcombine.high %v1133_v18, %v1148_v5 }
 0x32e   : > { %v1181_v23 = vcombine.high %v1157_v17, %v2684_v33  ;;  %v1239_v30 = vrot.slane %v1231_v21, %v3029_v7  ;;  %v1173_v34 = vrot.slane %v1165_v27, %v3029_v7  ;;  %v1182_v35 = vcombine.high %v1164_v26, %v2684_v33 }
 0x32f   : > { %2332 = vmatprep.subr.msk.mxu1 %vm1335_vm10, %v1223_v22  ;;  %v1247_v28 = vcombine.high %v1223_v22, %v2684_v33  ;;  %v1248_v31 = vcombine.high %v1230_v25, %v2684_v33  ;;  %v1246_v38 = vrot.slane %v1232_v29, %v3029_v7  ;;  %v1180_v39 = vrot.slane %v1166_v32, %v3029_v7 }
 0x330   : > { %2333 = vmatpush1.msk.msra.mxu1 %vm1335_vm10, %v1157_v17  ;;  %v1249_v36 = vcombine.high %v1239_v30, %v2684_v33  ;;  %v1183_v40 = vcombine.high %v1173_v34, %v2684_v33  ;;  %v1275_v54 = vrot.slane %v1267_v49, %v3025_v51 }
 0x331   : > { %2334 = vmatmul.mubr.msk.f32.vlgmr.msra.gmra.mrb[6].mxu1 %vm1331_vm11, %v326_v24  ;;  %2335 = vmatprep.subr.msk.mxu0 %vm1335_vm10, %v1247_v28  ;;  %v1250_v41 = vcombine.high %v1246_v38, %v2684_v33  ;;  %v1184_v42 = vcombine.high %v1180_v39, %v2684_v33 }
 0x332   : > { %2338 = vmatprep.subr.msk.mxu1 %vm1335_vm10, %v1230_v25  ;;  %2336 = vmatpush1.msk.msra.mxu0 %vm1335_vm10, %v1181_v23  ;;  %v1283_v55 = vcombine.low %v1259_v52, %v1275_v54  ;;  %v1284_v56 = vcombine.high %v1259_v52, %v1275_v54 }
 0x333   : > { %2339 = vmatpush1.msk.msra.mxu1 %vm1335_vm10, %v1164_v26  ;;  %2337 = vmatmul.mubr.msk.f32.vlgmr.msra.gmra.mrb[6].mxu0 %vm1331_vm11, %v326_v24 }
 0x334   : > { %2341 = vmatprep.subr.msk.mxu0 %vm1335_vm10, %v1248_v31  ;;  %2344 = vmatprep.subr.msk.mxu1 %vm1335_vm10, %v1239_v30  ;;  %v1291_v60 = vrot.slane %v1283_v55, %v3029_v7  ;;  %v1298_v8 = vrot.slane %v1284_v56, %v3029_v7 }
 0x335   : > { %1590 = vmatprep.mubr.f32.mxu1 %v2684_v33  ;;  %2342 = vmatpush1.msk.msra.mxu0 %vm1335_vm10, %v1182_v35 }
 0x336   : > { %2340 = vmatmul.mubr.msk.f32.vlgmr.msra.gmra.mrb[8].mxu1 %vm1331_vm11, %v326_v24  ;;  %2347 = vmatprep.subr.msk.mxu0 %vm1335_vm10, %v1249_v36 }
 0x337   : > { %2345 = vmatpush1.msk.msra.mxu1 %vm1335_vm10, %v1173_v34  ;;  %1661 = vmatprep.mubr.f32.mxu0 %v2684_v33 }
 0x338   : > { %2350 = vmatprep.subr.msk.mxu1 %vm1335_vm10, %v1246_v38  ;;  %2343 = vmatmul.mubr.msk.f32.vlgmr.msra.gmra.mrb[8].mxu0 %vm1331_vm11, %v326_v24 }
 0x339   : > { %2348 = vmatpush1.msk.msra.mxu0 %vm1335_vm10, %v1183_v40  ;;  %1732 = vmatprep.mubr.f32.mxu1 %v2684_v33 }
 0x33a   : > { %2353 = vmatprep.subr.msk.mxu0 %vm1335_vm10, %v1250_v41  ;;  %2346 = vmatmul.mubr.msk.f32.vlgmr.msra.gmra.mrb[10].mxu1 %vm1331_vm11, %v326_v24 }
 0x33b   : > { %2351 = vmatpush1.msk.msra.mxu1 %vm1335_vm10, %v1180_v39  ;;  %1803 = vmatprep.mubr.f32.mxu0 %v2684_v33 }
 0x33c   : > { %2349 = vmatmul.mubr.msk.f32.vlgmr.msra.gmra.mrb[10].mxu0 %vm1331_vm11, %v326_v24  ;;  %1874 = vmatprep.mubr.f32.mxu1 %v2684_v33 }
 0x33d   : > { %2354 = vmatpush1.msk.msra.mxu0 %vm1335_vm10, %v1184_v42  ;;  %1945 = vmatprep.mubr.f32.mxu0 %v2684_v33  ;;  %v1282_v33 = vrot.slane %v1268_v50, %v3025_v51 }
 0x33e   : > { %2352 = vmatmul.mubr.msk.f32.vlgmr.msra.gmra.mrb[12].mxu1 %vm1331_vm11, %v326_v24 }
 0x33f   : > { %v1299_v57 = vcombine.low %v1266_v53, %v1282_v33  ;;  %v1300_v58 = vcombine.high %v1266_v53, %v1282_v33 }
 0x340   : > { %2355 = vmatmul.mubr.msk.f32.vlgmr.msra.gmra.mrb[12].mxu0 %vm1331_vm11, %v326_v24 }
 0x341   : > { %v1307_v3 = vrot.slane %v1299_v57, %v3029_v7  ;;  %v1314_v59 = vrot.slane %v1300_v58, %v3029_v7 }
 0x343   : > { %v1315_v63 = vcombine.low %v1291_v60, %v1307_v3  ;;  %v1317_v1 = vcombine.low %v1298_v8, %v1314_v59  ;;  %v2328_v2 = vcombine.low %v1307_v3, %v1307_v3  ;;  %v1316_v37 = vcombine.high %v1291_v60, %v1307_v3 }
 0x344   : > { %v2329_v6 = vcombine.high %v1307_v3, %v1307_v3  ;;  %v2330_v15 = vcombine.low %v1314_v59, %v1314_v59  ;;  %v1318_v21 = vcombine.high %v1298_v8, %v1314_v59  ;;  %v2331_v25 = vcombine.high %v1314_v59, %v1314_v59 }
 0x404   : > { %v1450_v61 = vpop.f32.mrb[6].mxu1 }
 0x405   : > { %v1452_v62 = vpop.f32.mrb[7].mxu1  ;;  %v1451_v16 = vadd.f32 %v1450_v61, %v1315_v63 }
 0x406   : > { %v1521_v0 = vpop.f32.mrb[6].mxu0  ;;  %v1453_v22 = vadd.f32 %v2328_v2, %v1452_v62 }
 0x407   : > { %v1523_v4 = vpop.f32.mrb[7].mxu0  ;;  %v1522_v26 = vadd.f32 %v1521_v0, %v1316_v37 }
 0x408   : > { %v1524_v30 = vadd.f32 %v2329_v6, %v1523_v4 }
 0x409   : > { %v1592_v5 = vpop.f32.mrb[8].mxu1 }
 0x40a   : > { %v1593_v17 = vadd.f32 %v1592_v5, %v1317_v1  ;;  %v1594_v18 = vpop.f32.mrb[9].mxu1 }
 0x40b   : > { %v1595_v23 = vadd.f32 %v2330_v15, %v1594_v18  ;;  %v1663_v24 = vpop.f32.mrb[8].mxu0 }
 0x40c   : > { %v2356_v27 = vcombine.low %v1451_v16, %v1593_v17  ;;  %v1664_v28 = vadd.f32 %v1663_v24, %v1318_v21  ;;  %v1665_v29 = vpop.f32.mrb[9].mxu0 }
 0x40d   : > { %v2357_v31 = vcombine.low %v1453_v22, %v1595_v23  ;;  %v1666_v32 = vadd.f32 %v2331_v25, %v1665_v29  ;;  %v1734_v34 = vpop.f32.mrb[10].mxu1 }
 0x40e   : > { %v2358_v35 = vcombine.low %v1522_v26, %v1664_v28  ;;  %v1736_v36 = vpop.f32.mrb[11].mxu1  ;;  %v1992_v40 = vrot.slane %v2356_v27, %v3025_v51  ;;  %v1735_v45 = vadd.f32 %v1734_v34, %v1315_v63 }
 0x40f   : > { %v2359_v38 = vcombine.low %v1524_v30, %v1666_v32  ;;  %v1805_v39 = vpop.f32.mrb[10].mxu0  ;;  %v1999_v43 = vrot.slane %v2357_v31, %v3025_v51  ;;  %v1737_v49 = vadd.f32 %v2328_v2, %v1736_v36 }
 0x410   : > { %v2008_v41 = vrot.slane %v2358_v35, %v3025_v51  ;;  %v1807_v42 = vpop.f32.mrb[11].mxu0  ;;  %v1806_v33 = vadd.f32 %v1805_v39, %v1316_v37 }
 0x411   : > { %v2015_v44 = vrot.slane %v2359_v38, %v3025_v51  ;;  %v1876_v46 = vpop.f32.mrb[12].mxu1  ;;  %v1808_v0 = vadd.f32 %v2329_v6, %v1807_v42 }
 0x412   : > { %v2016_v47 = vcombine.low %v1992_v40, %v2008_v41  ;;  %v2017_v48 = vcombine.high %v1992_v40, %v2008_v41  ;;  %v1877_v50 = vadd.f32 %v1876_v46, %v1317_v1  ;;  %v1878_v52 = vpop.f32.mrb[13].mxu1 }
 0x413   : > { %v2032_v53 = vcombine.low %v1999_v43, %v2015_v44  ;;  %v2033_v54 = vcombine.high %v1999_v43, %v2015_v44  ;;  %v1879_v55 = vadd.f32 %v2330_v15, %v1878_v52  ;;  %v1947_v56 = vpop.f32.mrb[12].mxu0 }
 0x414   : > { %v2024_v57 = vrot.slane %v2016_v47, %v3029_v7  ;;  %v2031_v58 = vrot.slane %v2017_v48, %v3029_v7  ;;  %v2360_v3 = vcombine.low %v1735_v45, %v1877_v50  ;;  %v1948_v59 = vadd.f32 %v1947_v56, %v1318_v21  ;;  %v1949_v60 = vpop.f32.mrb[13].mxu0 }
 0x415   : > { %v2040_v8 = vrot.slane %v2032_v53, %v3029_v7  ;;  %v2047_v61 = vrot.slane %v2033_v54, %v3029_v7  ;;  %v2361_v62 = vcombine.low %v1737_v49, %v1879_v55  ;;  %v1950_v63 = vadd.f32 %v2331_v25, %v1949_v60 }
 0x416   : > { %v2362_v1 = vcombine.low %v1806_v33, %v1948_v59  ;;  %v2060_v15 = vrot.slane %v2360_v3, %v3025_v51 }
 0x417   : > { %v2048_v2 = vcombine.low %v2024_v57, %v2040_v8  ;;  %v2049_v4 = vcombine.high %v2024_v57, %v2040_v8  ;;  %v2050_v37 = vcombine.low %v2031_v58, %v2047_v61  ;;  %v2051_v5 = vcombine.high %v2031_v58, %v2047_v61 }
 0x418   : > { %v2076_v16 = vrot.slane %v2362_v1, %v3025_v51  ;;  %v2363_v17 = vcombine.low %v1808_v0, %v1950_v63  ;;  %v2067_v24 = vrot.slane %v2361_v62, %v3025_v51 }
 0x419   : > { %v2120_v18 = vsub.f32 0.0, %v2048_v2  ;;  %v2122_v21 = vsub.f32 0.0, %v2049_v4  ;;  %v2124_v22 = vsub.f32 0.0, %v2050_v37  ;;  %v2126_v23 = vsub.f32 0.0, %v2051_v5 }
 0x41a   : > { %v2084_v26 = vcombine.low %v2060_v15, %v2076_v16  ;;  %v2085_v27 = vcombine.high %v2060_v15, %v2076_v16  ;;  %v2083_v6 = vrot.slane %v2363_v17, %v3025_v51 }
 0x41b   : > { %v2128_v25 = vmul.f32 1.442695, %v2120_v18  ;;  %v2132_v28 = vmul.f32 1.442695, %v2122_v21  ;;  %v2136_v29 = vmul.f32 1.442695, %v2124_v22 }
 0x41c   : > { %v2092_v30 = vrot.slane %v2084_v26, %v3029_v7  ;;  %v2100_v31 = vcombine.low %v2067_v24, %v2083_v6  ;;  %v2140_v32 = vmul.f32 1.442695, %v2126_v23  ;;  %v2099_v34 = vrot.slane %v2085_v27, %v3029_v7 }
 0x41d   : > { %v2101_v35 = vcombine.high %v2067_v24, %v2083_v6  ;;  %2489 = vpow2.f32 %v2128_v25 }
 0x41e   : > { %v2108_v36 = vrot.slane %v2100_v31, %v3029_v7  ;;  %2491 = vpow2.f32 %v2132_v28 }
 0x41f   : > { %v2115_v38 = vrot.slane %v2101_v35, %v3029_v7  ;;  %2493 = vpow2.f32 %v2136_v29 }
 0x420   : > { %v2116_v39 = vcombine.low %v2092_v30, %v2108_v36  ;;  %v2117_v40 = vcombine.high %v2092_v30, %v2108_v36  ;;  %2495 = vpow2.f32 %v2140_v32 }
 0x421   : > { %v2118_v51 = vcombine.low %v2099_v34, %v2115_v38  ;;  %v2119_v41 = vcombine.high %v2099_v34, %v2115_v38 }
 0x422   : > { %v2121_v42 = vsub.f32 0.0, %v2116_v39  ;;  %v2123_v43 = vsub.f32 0.0, %v2117_v40 }
 0x423   : > { %v2125_v44 = vsub.f32 0.0, %v2118_v51  ;;  %v2127_v45 = vsub.f32 0.0, %v2119_v41 }
 0x424   : > { %v2130_v46 = vmul.f32 1.442695, %v2121_v42  ;;  %v2134_v47 = vmul.f32 1.442695, %v2123_v43 }
 0x425   : > { %v2138_v48 = vmul.f32 1.442695, %v2125_v44  ;;  %v2142_v49 = vmul.f32 1.442695, %v2127_v45 }
 0x426   : > { %2497 = vpow2.f32 %v2130_v46 }
 0x427   : > { %2499 = vpow2.f32 %v2134_v47  ;;  %v2490_v50 = vpop.eup %2489 }
 0x428   : > { %2501 = vpow2.f32 %v2138_v48  ;;  %v2492_v52 = vpop.eup %2491  ;;  %v2144_v54 = vadd.f32 1.0, %v2490_v50 }
 0x429   : > { %2503 = vpow2.f32 %v2142_v49  ;;  %v2494_v7 = vpop.eup %2493  ;;  %v2146_v33 = vadd.f32 1.0, %v2492_v52 }
 0x42a   : > { %v2496_v53 = vpop.eup %2495  ;;  %v2148_v55 = vadd.f32 1.0, %v2494_v7  ;;  %2505 = vrcp.f32 %v2144_v54 }
 0x42b   : > { %v2150_v56 = vadd.f32 1.0, %v2496_v53  ;;  %2507 = vrcp.f32 %v2146_v33 }
 0x42c   : > { %2509 = vrcp.f32 %v2148_v55 }
 0x42d   : > { %2511 = vrcp.f32 %v2150_v56 }
 0x430   : > { %v2498_v57 = vpop.eup %2497 }
 0x431   : > { %v2500_v58 = vpop.eup %2499  ;;  %v2145_v3 = vadd.f32 1.0, %v2498_v57 }
 0x432   : > { %v2502_v59 = vpop.eup %2501  ;;  %v2147_v60 = vadd.f32 1.0, %v2500_v58 }
 0x433   : > { %v2504_v8 = vpop.eup %2503  ;;  %v2149_v61 = vadd.f32 1.0, %v2502_v59  ;;  %2513 = vrcp.f32 %v2145_v3 }
 0x434   : > { %v2151_v62 = vadd.f32 1.0, %v2504_v8  ;;  %2515 = vrcp.f32 %v2147_v60  ;;  %v2506_v63 = vpop.eup %2505 }
 0x435   : > { %2517 = vrcp.f32 %v2149_v61  ;;  %v2508_v0 = vpop.eup %2507 }
 0x436   : > { %2519 = vrcp.f32 %v2151_v62  ;;  %v2510_v1 = vpop.eup %2509 }
 0x437   : > { %v2512_v2 = vpop.eup %2511 }
 0x43d   : > { %v2514_v4 = vpop.eup %2513 }
 0x43e   : > { %v2516_v37 = vpop.eup %2515  ;;  %v2168_v5 = vcombine.low %v2506_v63, %v2514_v4  ;;  %v2169_v15 = vcombine.high %v2506_v63, %v2514_v4 }
 0x43f   : > { %v2518_v16 = vpop.eup %2517  ;;  %v2170_v17 = vcombine.low %v2508_v0, %v2516_v37  ;;  %v2171_v18 = vcombine.high %v2508_v0, %v2516_v37 }
 0x440   : > { %v2520_v21 = vpop.eup %2519  ;;  %v2172_v22 = vcombine.low %v2510_v1, %v2518_v16  ;;  %v2173_v23 = vcombine.high %v2510_v1, %v2518_v16  ;;  %v2184_v24 = vmul.f32 %v2168_v5, %v2934_v9  ;;  %v2185_v26 = vmul.f32 %v2169_v15, %v2936_v10 }
 0x441   : > { %v2174_v27 = vcombine.low %v2512_v2, %v2520_v21  ;;  %v2175_v6 = vcombine.high %v2512_v2, %v2520_v21  ;;  %v2186_v25 = vmul.f32 %v2170_v17, %v2938_v11  ;;  %v2187_v28 = vmul.f32 %v2171_v18, %v2941_v12 }
 0x442   : > { %v2188_v29 = vmul.f32 %v2172_v22, %v2943_v13  ;;  %v2189_v30 = vmul.f32 %v2173_v23, %v2945_v14  ;;  %2192 = vst [vmem:[%s323_s19] sm:$0xff] %v2184_v24  ;;  %2193 = vst [vmem:[%s323_s19 + $0x8] sm:$0xff] %v2185_v26 }
 0x443   : > { %v2190_v9 = vmul.f32 %v2174_v27, %v2954_v19  ;;  %v2191_v10 = vmul.f32 %v2175_v6, %v2956_v20  ;;  %2194 = vst [vmem:[%s323_s19 + $0x10] sm:$0xff] %v2186_v25  ;;  %2195 = vst [vmem:[%s323_s19 + $0x18] sm:$0xff] %v2187_v28 }
 0x444   : > { %2196 = vst [vmem:[%s323_s19 + $0x20] sm:$0xff] %v2188_v29  ;;  %2197 = vst [vmem:[%s323_s19 + $0x28] sm:$0xff] %v2189_v30 }
 0x445   : > { %2198 = vst [vmem:[%s323_s19 + $0x30] sm:$0xff] %v2190_v9  ;;  %2199 = vst [vmem:[%s323_s19 + $0x38] sm:$0xff] %v2191_v10 }
 0x446   : > { %2620 = shalt.err (!%p2617_p6)
}
 0x447   : > { %s2621_s23 = scalar_lea.hbm %s3127_s15, 1024  ;;  %s2625_s29 = scalar_lea.hbm %s3182_s7, 2048 }
 0x448   : > { %p2622_p12 = scmp.ne.s32.totalorder %s3127_s15, %s2621_s23  ;;  %p2626_p11 = scmp.lt.u32.totalorder %s3127_s15, %s3182_s7 }
 0x449   : > { %p2627_p7 = scmp.lt.u32.totalorder %s2625_s29, %s2621_s23  ;;  %p2629_p8 = scmp.lt.u32.totalorder %s2621_s23, %s3127_s15 }
 0x44a   : > { %p2623_p13 = pnand %p2622_p12, %p3209_p4 }
 0x44b   : > { %p2628_p3 = por %p2627_p7, %p2626_p11 }
 0x44c   : > { %p2624_p1 = pneg %p2623_p13 }
 0x44d   : > { %p2630_p5 = por %p2629_p8, %p2628_p3 }
 0x44f   : > { %p2631_p10 = pnand %p2630_p5, %p2624_p1 }
 0x451   : > { %2634 = shalt.err (!%p2631_p10)
}
 0x452   : > { %s2691_s17 = smov 256   ;;  %s2692_s22 = smov 16  }
 0x453   : > { %2420 = dma.vmem_to_hbm [thread:$0]  (%p3209_p4), %s3129_s1, 1024, %s3127_s15, %s2201_s30, %s2691_s17, %s2691_s17, %s2692_s22  }
 0x454 PF: > { %s2229_s19 = sand.u32 1, %s2665_s24   ;;  %p3210_p2 = scmp.ne.s32.totalorder %s3198_s14, 0 }
 0x455   : > { %p3211_p0 = scmp.ge.s32.totalorder %s2677_s27, 2  ;;  %s2230_s28 = scalar_lea.sflag [#allocation5], %s2229_s19 }
 0x457   : > { %p2434_p9 = pnand %p3211_p0, %p3210_p2 }
 0x459   : > { %2660 = dma.done.wait (!%p2434_p9), %s2230_s28, 1024  }
 0x45a   : > { %2662 = vsyncadd (!%p2434_p9), %s2230_s28, 4294966272  ;;  %s3212_s27 = sld [smem:[#allocation14_spill]]  ;;  %s3213_s21 = sld [smem:[#allocation13_spill]] }
 0x45b   : > { %s3214_s26 = sld [smem:[#allocation15_spill]]  ;;  %s3215_s24 = smov %s2669_s25 }
 0x460   : > { %p21_p6 = scmp.ge.s32.totalorder %s3212_s27, 4   ;;  %s3216_s25 = smov %s3213_s21 }
 0x462   :  { %23 = sbr.rel (!%p21_p6) target bundleno = 8 (0x8), region = 101 }
 0x469   :  { %2235 = vsyncpa [#allocation4], 1 }
 0x46a   :  { %2237 = vsyncpa [#allocation4 + $0x1], 1 }
 0x46b   :  { %2238 = vsyncpa [#allocation7], 1 }
 0x46c   :  { %2239 = vsyncpa [#allocation5], 1 }
 0x46d   :  { %2241 = vsyncpa [#allocation5 + $0x1], 1 }

</bundles_post_ra>
